<compile_context>
chip_gen: v5e
topology: v5e:2x2
jax: 0.10.0
libtpu: 0.0.40
codegen_flags: <defaults>
</compile_context>

<pallas_src>
import functools

import jax
import jax.numpy as jnp
from jax.experimental import pallas as pl
from jax.experimental.pallas import tpu as pltpu

EPS = 1e-5


# --------------------------------------------------------------------------- #
# Sizing helpers                                                               #
# --------------------------------------------------------------------------- #
def _round_up(x, m):
    return ((x + m - 1) // m) * m


def _sublane(dtype):
    # Sublane packing: 8 rows for 32-bit, 16 for 16-bit, 32 for 8-bit dtypes.
    return {4: 8, 2: 16, 1: 32}.get(jnp.dtype(dtype).itemsize, 8)


def _vmem_limit_cap():
    """Per-chip usable VMEM cap (leave headroom for compiler-internal scratch)."""
    cap = None
    try:
        info = pltpu.get_tpu_info()
        cap = getattr(info, "vmem_capacity_bytes", None)
    except Exception:
        cap = None
    if not cap:
        cap = 64 * 1024 * 1024            # conservative default: v7x per-TC VMEM
    return max(int(cap) - 16 * 1024 * 1024, 24 * 1024 * 1024)


def _tile_budget():
    """Target working-set budget for the pipelined tiles."""
    return min(32 * 1024 * 1024, _vmem_limit_cap() // 2)


def _pick_tile_rows(rows, per_row_bytes, budget, *, align, floor=None, pref_mult=None):
    """Largest row tile fitting `budget`, rounded to `pref_mult`, floored at `floor`."""
    floor = align if floor is None else floor
    pref_mult = align if pref_mult is None else pref_mult
    rows_cap = _round_up(rows, align)
    if rows_cap <= floor:
        return rows_cap                       # whole problem fits one (small) block
    t = budget // max(per_row_bytes, 1)
    t = min(t, 1024, rows_cap)
    t = max(t, floor)
    mult = pref_mult if t >= pref_mult else align
    t = (t // mult) * mult
    return max(t, align)


# --------------------------------------------------------------------------- #
# Shared LayerNorm epilogue (f32, two-pass/centered variance like PyTorch)     #
# --------------------------------------------------------------------------- #
def _layernorm_rows(res_f32, gamma, beta):
    mean = jnp.mean(res_f32, axis=-1, keepdims=True)
    cent = res_f32 - mean
    var = jnp.mean(cent * cent, axis=-1, keepdims=True)
    inv = jax.lax.rsqrt(var + EPS)
    return cent * inv * gamma + beta


# --------------------------------------------------------------------------- #
# Kernel 1: generic  (x + y) -> LayerNorm                                      #
# --------------------------------------------------------------------------- #
def _residual_layernorm_kernel(x_ref, y_ref, g_ref, b_ref, o_ref):
    res = x_ref[...].astype(jnp.float32) + y_ref[...].astype(jnp.float32)
    o_ref[...] = _layernorm_rows(res, g_ref[...], b_ref[...]).astype(o_ref.dtype)


def residual_layernorm(x, sublayer_out, gamma, beta, *, tile_rows=None):
    """Fused (x + sublayer_out) followed by LayerNorm over the last dim."""
    orig_shape = x.shape
    d_model = orig_shape[-1]
    x2 = x.reshape(-1, d_model)
    y2 = sublayer_out.reshape(-1, d_model)      # native dtype; kernel upcasts to f32
    rows = x2.shape[0]

    x_item = jnp.dtype(x2.dtype).itemsize
    y_item = jnp.dtype(y2.dtype).itemsize
    align = max(_sublane(x2.dtype), _sublane(y2.dtype))
    budget = _tile_budget()

    if tile_rows is None:
        # x, y, out streams (double-buffered) + f32 intermediates.
        per_row = (2 * x_item + 2 * y_item + 2 * x_item + 8) * d_model
        tile_rows = _pick_tile_rows(rows, per_row, budget, align=align)

    g2 = gamma.reshape(1, d_model).astype(jnp.float32)
    b2 = beta.reshape(1, d_model).astype(jnp.float32)

    grid = (pl.cdiv(rows, tile_rows),)          # edge block masked; LayerNorm is per-row
    out = pl.pallas_call(
        _residual_layernorm_kernel,
        out_shape=jax.ShapeDtypeStruct((rows, d_model), x.dtype),
        grid_spec=pltpu.PrefetchScalarGridSpec(
            num_scalar_prefetch=0,
            grid=grid,
            in_specs=[
                pl.BlockSpec((tile_rows, d_model), lambda i: (i, 0)),
                pl.BlockSpec((tile_rows, d_model), lambda i: (i, 0)),
                pl.BlockSpec((1, d_model), lambda i: (0, 0)),
                pl.BlockSpec((1, d_model), lambda i: (0, 0)),
            ],
            out_specs=pl.BlockSpec((tile_rows, d_model), lambda i: (i, 0)),
        ),
        compiler_params=pltpu.CompilerParams(
            dimension_semantics=("parallel",),
            vmem_limit_bytes=_vmem_limit_cap(),
        ),
    )(x2, y2, g2, b2)
    return out.reshape(orig_shape)


# --------------------------------------------------------------------------- #
# Kernel 2a: fused  LayerNorm(x + (x @ W + bias)) -- full-K (W resident)       #
# --------------------------------------------------------------------------- #
def _linear_resln_fullk_kernel(x_ref, w_ref, bias_ref, g_ref, b_ref, o_ref):
    x = x_ref[...]
    # TODO(synk): if this ever becomes MXU-bound with f32 inputs on v6e/v7x, cast the
    # dot operands to bf16 (keep preferred_element_type=f32 and the f32 epilogue).
    y = jnp.dot(x, w_ref[...], preferred_element_type=jnp.float32)
    res = x.astype(jnp.float32) + y + bias_ref[...]
    o_ref[...] = _layernorm_rows(res, g_ref[...], b_ref[...]).astype(o_ref.dtype)


# --------------------------------------------------------------------------- #
# Kernel 2b: fused  LayerNorm(x + (x @ W + bias)) -- split-K accumulator       #
# --------------------------------------------------------------------------- #
def _linear_resln_splitk_kernel(xk_ref, w_ref, bias_ref, g_ref, b_ref, o_ref,
                                acc_ref, xrow_ref, *, tile_k):
    k = pl.program_id(1)

    @pl.when(k == 0)
    def _():
        acc_ref[...] = jnp.zeros_like(acc_ref)

    acc_ref[...] += jnp.dot(xk_ref[...], w_ref[...],
                            preferred_element_type=jnp.float32)

    # Stash this K-slice of x so the residual add needs no second HBM stream of x.
    col = pl.multiple_of(k * tile_k, tile_k)
    xrow_ref[:, pl.ds(col, tile_k)] = xk_ref[...]

    @pl.when(k == pl.num_programs(1) - 1)
    def _():
        res = xrow_ref[...].astype(jnp.float32) + acc_ref[...] + bias_ref[...]
        o_ref[...] = _layernorm_rows(res, g_ref[...], b_ref[...]).astype(o_ref.dtype)


def _splitk_vmem_need(tile_rows, tile_k, d_model, x_item, w_item, o_item):
    return (2 * tile_k * d_model * w_item          # W blocks (double-buffered)
            + 2 * tile_rows * tile_k * x_item      # x K-slices
            + 2 * tile_rows * d_model * o_item     # output tiles
            + 4 * tile_rows * d_model              # f32 accumulator scratch
            + tile_rows * d_model * x_item         # x row stash scratch
            + 8 * tile_rows * d_model              # f32 epilogue temps
            + 16 * d_model + (2 << 20))            # bias/gamma/beta + slack


def linear_residual_layernorm(x, W, bias, gamma, beta, *, tile_rows=None, tile_k=None):
    """LayerNorm(x + (x @ W + bias)) in a single pallas_call (MXU + VPU fused)."""
    orig_shape = x.shape
    d_model = orig_shape[-1]
    assert W.shape == (d_model, d_model)
    x2 = x.reshape(-1, d_model)
    rows = x2.shape[0]

    x_item = jnp.dtype(x2.dtype).itemsize
    w_item = jnp.dtype(W.dtype).itemsize
    o_item = x_item
    align = _sublane(x2.dtype)

    vmem_cap = _vmem_limit_cap()
    budget = _tile_budget()

    bias2 = bias.reshape(1, d_model).astype(jnp.float32)   # stay f32 -> added in epilogue
    g2 = gamma.reshape(1, d_model).astype(jnp.float32)
    b2 = beta.reshape(1, d_model).astype(jnp.float32)

    w_full_bytes = 2 * d_model * d_model * w_item           # full-W block, double-buffered
    if tile_k is not None:
        use_fullk = (tile_k == d_model)
    else:
        # Prefer keeping the whole W resident (constant block index -> DMA'd once).
        use_fullk = (w_full_bytes <= budget * 2 // 3) or (d_model % 128 != 0)

    if use_fullk:
        if tile_rows is None:
            per_row = (2 * d_model * x_item + 2 * d_model * o_item + 8 * d_model)
            row_budget = max(budget - w_full_bytes, 1 << 20)
            tile_rows = _pick_tile_rows(rows, per_row, row_budget,
                                        align=align, floor=256, pref_mult=256)
        grid = (pl.cdiv(rows, tile_rows),)
        out = pl.pallas_call(
            _linear_resln_fullk_kernel,
            out_shape=jax.ShapeDtypeStruct((rows, d_model), x.dtype),
            grid_spec=pltpu.PrefetchScalarGridSpec(
                num_scalar_prefetch=0,
                grid=grid,
                in_specs=[
                    pl.BlockSpec((tile_rows, d_model), lambda i: (i, 0)),  # x
                    pl.BlockSpec((d_model, d_model), lambda i: (0, 0)),    # W (resident)
                    pl.BlockSpec((1, d_model), lambda i: (0, 0)),          # bias (f32)
                    pl.BlockSpec((1, d_model), lambda i: (0, 0)),          # gamma
                    pl.BlockSpec((1, d_model), lambda i: (0, 0)),          # beta
                ],
                out_specs=pl.BlockSpec((tile_rows, d_model), lambda i: (i, 0)),
            ),
            compiler_params=pltpu.CompilerParams(
                dimension_semantics=("parallel",),
                vmem_limit_bytes=vmem_cap,
            ),
        )(x2, W, bias2, g2, b2)
        return out.reshape(orig_shape)

    # ---- split-K path (large d_model): keep tile_rows >= 256, shrink tile_k first ----
    floor_rows = min(256, _round_up(rows, align))
    if tile_k is None:
        tile_k = 128
        for cand in (1024, 512, 256, 128):
            if d_model % cand:
                continue
            w_bytes = 2 * cand * d_model * w_item
            row_bytes = floor_rows * (2 * cand * x_item + 2 * d_model * o_item
                                      + 4 * d_model + d_model * x_item)
            if w_bytes + row_bytes <= budget:
                tile_k = cand
                break
    assert d_model % tile_k == 0, "tile_k must divide d_model"

    if tile_rows is None:
        w_bytes = 2 * tile_k * d_model * w_item
        per_row = (2 * tile_k * x_item + 2 * d_model * o_item
                   + 4 * d_model + d_model * x_item + 8 * d_model)
        row_budget = max(budget - w_bytes, 1 << 20)
        tile_rows = _pick_tile_rows(rows, per_row, row_budget,
                                    align=align, floor=256, pref_mult=256)
    # Guard: never exceed the chip's physical/scoped VMEM cap.
    while (tile_rows > align
           and _splitk_vmem_need(tile_rows, tile_k, d_model,
                                 x_item, w_item, o_item) > vmem_cap):
        tile_rows = max(align, ((tile_rows // 2 + align - 1) // align) * align)

    grid = (pl.cdiv(rows, tile_rows), d_model // tile_k)
    kernel = functools.partial(_linear_resln_splitk_kernel, tile_k=tile_k)
    out = pl.pallas_call(
        kernel,
        out_shape=jax.ShapeDtypeStruct((rows, d_model), x.dtype),
        grid_spec=pltpu.PrefetchScalarGridSpec(
            num_scalar_prefetch=0,
            grid=grid,
            in_specs=[
                pl.BlockSpec((tile_rows, tile_k), lambda i, k: (i, k)),    # x (K slice)
                pl.BlockSpec((tile_k, d_model), lambda i, k: (k, 0)),      # W
                pl.BlockSpec((1, d_model), lambda i, k: (0, 0)),           # bias (f32)
                pl.BlockSpec((1, d_model), lambda i, k: (0, 0)),           # gamma
                pl.BlockSpec((1, d_model), lambda i, k: (0, 0)),           # beta
            ],
            out_specs=pl.BlockSpec((tile_rows, d_model), lambda i, k: (i, 0)),
            scratch_shapes=[
                pltpu.VMEM((tile_rows, d_model), jnp.float32),   # f32 accumulator
                pltpu.VMEM((tile_rows, d_model), x2.dtype),      # x row stash
            ],
        ),
        compiler_params=pltpu.CompilerParams(
            dimension_semantics=("parallel", "arbitrary"),
            vmem_limit_bytes=vmem_cap,
        ),
    )(x2, W, bias2, g2, b2)
    return out.reshape(orig_shape)


# --------------------------------------------------------------------------- #
# Module                                                                       #
# --------------------------------------------------------------------------- #
class Linear:
    """Deterministic Linear(d_model, d_model), used as an example sublayer."""

    def __init__(self, W, b):
        self.W = W
        self.b = b

    def __call__(self, x):
        return jnp.dot(x, self.W, precision=jax.lax.Precision.HIGHEST) + self.b


class Residual:
    """JAX/Pallas port of the PyTorch Residual module: LayerNorm(x + sublayer(x))."""

    def __init__(self, d_model):
        self.d_model = d_model
        # LayerNorm(d_model) parameters (torch default init).
        self.gamma = jnp.ones((d_model,), jnp.float32)
        self.beta = jnp.zeros((d_model,), jnp.float32)

    def __call__(self, x, sublayer):
        if isinstance(sublayer, Linear):
            # Fully fused: matmul + bias + residual + LayerNorm in one kernel.
            return linear_residual_layernorm(x, sublayer.W, sublayer.b,
                                             self.gamma, self.beta)
        # TODO(synk): arbitrary opaque sublayer modules cannot be traced into the
        # kernel; evaluate them in plain JAX and fuse only (add + LayerNorm).
        y = sublayer(x)
        return residual_layernorm(x, y, self.gamma, self.beta)


def _reference(x, y, gamma, beta):
    res = x + y
    mean = jnp.mean(res, axis=-1, keepdims=True)
    var = jnp.mean((res - mean) ** 2, axis=-1, keepdims=True)
    return (res - mean) / jnp.sqrt(var + EPS) * gamma + beta


if __name__ == "__main__":
    key = jax.random.PRNGKey(0)
    kx, kw, kb, kx3, kw3, kb3 = jax.random.split(key, 6)

    # --- path 1: known Linear sublayer -> fully fused full-K kernel (W resident) ---
    batch, seq, d_model = 2, 9, 128      # rows = 18 -> exercises a masked edge block
    x = jax.random.normal(kx, (batch, seq, d_model), jnp.float32)
    W = jax.random.normal(kw, (d_model, d_model), jnp.float32) * 0.02
    b = jax.random.normal(kb, (d_model,), jnp.float32) * 0.01

    module = Residual(d_model)
    sublayer = Linear(W, b)

    y_ref = jnp.dot(x, W, precision=jax.lax.Precision.HIGHEST) + b
    ref = _reference(x, y_ref, module.gamma, module.beta)

    out_fused = jax.block_until_ready(module(x, sublayer))
    assert out_fused.shape == x.shape
    assert jnp.allclose(out_fused, ref, atol=2e-3, rtol=2e-3), "fused full-K mismatch"

    # --- path 2: opaque sublayer callable -> fused add + LayerNorm kernel ---
    out_generic = jax.block_until_ready(module(x, lambda t: y_ref))
    assert out_generic.shape == x.shape
    assert jnp.allclose(out_generic, ref, atol=1e-4, rtol=1e-4), "generic path mismatch"

    # --- path 3: split-K accumulator variant (forced via explicit tile_k) ---
    d2 = 256
    x3 = jax.random.normal(kx3, (2, 5, d2), jnp.float32)
    W3 = jax.random.normal(kw3, (d2, d2), jnp.float32) * 0.02
    b3 = jax.random.normal(kb3, (d2,), jnp.float32) * 0.01
    mod3 = Residual(d2)
    y3 = jnp.dot(x3, W3, precision=jax.lax.Precision.HIGHEST) + b3
    ref3 = _reference(x3, y3, mod3.gamma, mod3.beta)
    out3 = jax.block_until_ready(
        linear_residual_layernorm(x3, W3, b3, mod3.gamma, mod3.beta, tile_k=128))
    assert out3.shape == x3.shape
    assert jnp.allclose(out3, ref3, atol=2e-3, rtol=2e-3), "fused split-K mismatch"

    print("KERNEL_OK")
</pallas_src>

<mosaic_0001>
module attributes {stable_mosaic.version = 11 : i64} {
  func.func @_linear_resln_fullk_kernel(%arg0: i32, %arg1: memref<24x128xf32, #tpu.memory_space<vmem>>, %arg2: memref<128x128xf32, #tpu.memory_space<vmem>>, %arg3: memref<1x128xf32, #tpu.memory_space<vmem>>, %arg4: memref<1x128xf32, #tpu.memory_space<vmem>>, %arg5: memref<1x128xf32, #tpu.memory_space<vmem>>, %arg6: memref<24x128xf32, #tpu.memory_space<vmem>>) attributes {dimension_semantics = [#tpu.dimension_semantics<parallel>], iteration_bounds = array<i64: 1>, scalar_prefetch = 0 : i64, scratch_operands = 0 : i64, tpu.core_type = #tpu.core_type<tc>, window_params = [{transform_indices = @transform_0, window_bounds = array<i64: 24, 128>}, {pipeline_mode = #tpu.pipeline_mode<synchronous>, transform_indices = @transform_1, window_bounds = array<i64: 128, 128>}, {pipeline_mode = #tpu.pipeline_mode<synchronous>, transform_indices = @transform_2, window_bounds = array<i64: 1, 128>}, {pipeline_mode = #tpu.pipeline_mode<synchronous>, transform_indices = @transform_3, window_bounds = array<i64: 1, 128>}, {pipeline_mode = #tpu.pipeline_mode<synchronous>, transform_indices = @transform_4, window_bounds = array<i64: 1, 128>}, {transform_indices = @transform_5, window_bounds = array<i64: 24, 128>}]} {
    %c0 = arith.constant 0 : index
    %c0_0 = arith.constant 0 : index
    %0 = vector.load %arg1[%c0, %c0_0] : memref<24x128xf32, #tpu.memory_space<vmem>>, vector<24x128xf32>
    %c0_1 = arith.constant 0 : index
    %c0_2 = arith.constant 0 : index
    %1 = vector.load %arg2[%c0_1, %c0_2] : memref<128x128xf32, #tpu.memory_space<vmem>>, vector<128x128xf32>
    %cst = arith.constant dense<0.000000e+00> : vector<24x128xf32>
    %2 = tpu.matmul %0, %1, %cst {dimension_numbers = #tpu.dot_dimension_numbers<[1], [0], [0], [1], [0, 0, 1, 1], [], []>} : vector<24x128xf32>, vector<128x128xf32>, vector<24x128xf32> -> vector<24x128xf32>
    %3 = arith.addf %0, %2 : vector<24x128xf32>
    %c0_3 = arith.constant 0 : index
    %c0_4 = arith.constant 0 : index
    %4 = vector.load %arg3[%c0_3, %c0_4] : memref<1x128xf32, #tpu.memory_space<vmem>>, vector<1x128xf32>
    %5 = vector.broadcast %4 : vector<1x128xf32> to vector<24x128xf32>
    %6 = arith.addf %3, %5 : vector<24x128xf32>
    %c0_5 = arith.constant 0 : index
    %c0_6 = arith.constant 0 : index
    %7 = vector.load %arg4[%c0_5, %c0_6] : memref<1x128xf32, #tpu.memory_space<vmem>>, vector<1x128xf32>
    %c0_7 = arith.constant 0 : index
    %c0_8 = arith.constant 0 : index
    %8 = vector.load %arg5[%c0_7, %c0_8] : memref<1x128xf32, #tpu.memory_space<vmem>>, vector<1x128xf32>
    %cst_9 = arith.constant dense<0.000000e+00> : vector<24xf32>
    %9 = vector.multi_reduction <add>, %6, %cst_9 [1] : vector<24x128xf32> to vector<24xf32>
    %10 = vector.shape_cast %9 : vector<24xf32> to vector<24x1xf32>
    %cst_10 = arith.constant 1.280000e+02 : f32
    %11 = vector.broadcast %cst_10 : f32 to vector<24x1xf32>
    %12 = arith.divf %10, %11 : vector<24x1xf32>
    %13 = vector.broadcast %12 : vector<24x1xf32> to vector<24x128xf32>
    %14 = arith.subf %6, %13 : vector<24x128xf32>
    %15 = arith.mulf %14, %14 : vector<24x128xf32>
    %cst_11 = arith.constant dense<0.000000e+00> : vector<24xf32>
    %16 = vector.multi_reduction <add>, %15, %cst_11 [1] : vector<24x128xf32> to vector<24xf32>
    %17 = vector.shape_cast %16 : vector<24xf32> to vector<24x1xf32>
    %cst_12 = arith.constant 1.280000e+02 : f32
    %18 = vector.broadcast %cst_12 : f32 to vector<24x1xf32>
    %19 = arith.divf %17, %18 : vector<24x1xf32>
    %cst_13 = arith.constant 9.99999974E-6 : f32
    %20 = vector.broadcast %cst_13 : f32 to vector<24x1xf32>
    %21 = arith.addf %19, %20 : vector<24x1xf32>
    %22 = math.rsqrt %21 : vector<24x1xf32>
    %23 = vector.broadcast %22 : vector<24x1xf32> to vector<24x128xf32>
    %24 = arith.mulf %14, %23 : vector<24x128xf32>
    %25 = vector.broadcast %7 : vector<1x128xf32> to vector<24x128xf32>
    %26 = arith.mulf %24, %25 : vector<24x128xf32>
    %27 = vector.broadcast %8 : vector<1x128xf32> to vector<24x128xf32>
    %28 = arith.addf %26, %27 : vector<24x128xf32>
    %c0_14 = arith.constant 0 : index
    %c0_15 = arith.constant 0 : index
    %29 = vector.load %arg6[%c0_14, %c0_15] : memref<24x128xf32, #tpu.memory_space<vmem>>, vector<24x128xf32>
    tpu.vector_store %arg6[%c0_14, %c0_15], %28 {strides = array<i32>} : memref<24x128xf32, #tpu.memory_space<vmem>>, vector<24x128xf32>,
    return
  }
  func.func @transform_0(%arg0: i32) -> (i32, i32) {
    %c0_i32 = arith.constant 0 : i32
    %c0_i32_0 = arith.constant 0 : i32
    return %arg0, %c0_i32 : i32, i32
  }
  func.func @transform_1(%arg0: i32) -> (i32, i32) {
    %c0_i32 = arith.constant 0 : i32
    %c0_i32_0 = arith.constant 0 : i32
    %c0_i32_1 = arith.constant 0 : i32
    return %c0_i32, %c0_i32_0 : i32, i32
  }
  func.func @transform_2(%arg0: i32) -> (i32, i32) {
    %c0_i32 = arith.constant 0 : i32
    %c0_i32_0 = arith.constant 0 : i32
    %c0_i32_1 = arith.constant 0 : i32
    return %c0_i32, %c0_i32_0 : i32, i32
  }
  func.func @transform_3(%arg0: i32) -> (i32, i32) {
    %c0_i32 = arith.constant 0 : i32
    %c0_i32_0 = arith.constant 0 : i32
    %c0_i32_1 = arith.constant 0 : i32
    return %c0_i32, %c0_i32_0 : i32, i32
  }
  func.func @transform_4(%arg0: i32) -> (i32, i32) {
    %c0_i32 = arith.constant 0 : i32
    %c0_i32_0 = arith.constant 0 : i32
    %c0_i32_1 = arith.constant 0 : i32
    return %c0_i32, %c0_i32_0 : i32, i32
  }
  func.func @transform_5(%arg0: i32) -> (i32, i32) {
    %c0_i32 = arith.constant 0 : i32
    %c0_i32_0 = arith.constant 0 : i32
    return %arg0, %c0_i32 : i32, i32
  }
}

</mosaic_0001>

<bundles_post_ra>
// kernel: tpu_custom_call.1
= control target key start
LH: loop header
LB: loop body
LE: loop exit
PB: predicated region body
PF: predicated region fallthrough
CT: control target
= control target key end

     0   :  { %10 = vsyncpa [#allocation3], 0  ;;  %s402_s0 = inlined_call_operand.hbm [shape: f32[18,128], index: 0, kind: input, shape index: {}]   ;;  %s403_s1 = inlined_call_operand.hbm [shape: f32[128,128], index: 1, kind: input, shape index: {}]   ;;  %s404_s2 = inlined_call_operand.vmem [shape: f32[1,128], index: 2, kind: input, shape index: {}]   ;;  %s405_s3 = inlined_call_operand.vmem [shape: f32[1,128], index: 3, kind: input, shape index: {}]   ;;  %s406_s4 = inlined_call_operand.vmem [shape: f32[1,128], index: 4, kind: input, shape index: {}]   ;;  %s407_s5 = inlined_call_operand.hbm [shape: f32[18,128], index: 5, kind: output, shape index: {}]  }
   0x1   :  { %11 = vsyncpa [#allocation6], 0 }
   0x2   :  { %12 = vsyncpa [#allocation4], 0  ;;  %s17_s20 = sshll.u32 %s402_s0, 4  ;;  %s339_s21 = smov [#allocation2]   ;;  %s18_s20 = int_to_ptr.hbm [resolvable:$true] %s17_s20 }
   0x3   :  { %s19_s22 = sshll.u32 %s339_s21, 4  ;;  %s30_s25 = sshll.u32 %s403_s1, 4  ;;  %s20_s22 = int_to_ptr.vmem [resolvable:$true] %s19_s22  ;;  %s31_s25 = int_to_ptr.hbm [resolvable:$true] %s30_s25 }
   0x4   :  { %s340_s26 = smov 128   ;;  %s341_s27 = smov 8  }
   0x5   :  { %25 = dma.hbm_to_vmem [thread:$0]  %s18_s20, 384, %s20_s22, [#allocation3], %s340_s26, %s340_s26, %s341_s27  }
   0x6   :  { %s342_s28 = smov [#allocation5]  }
   0x7   :  { %s32_s29 = sshll.u32 %s342_s28, 4  ;;  %s33_s29 = int_to_ptr.vmem [resolvable:$true] %s32_s29 }
   0x8   :  { %38 = dma.hbm_to_vmem [thread:$0]  %s31_s25, 2048, %s33_s29, [#allocation6], %s340_s26, %s340_s26, %s341_s27  }
   0x9   :  { %333 = dma.done.wait [#allocation3], 384  }
   0xa   :  { %334 = vsyncadd [#allocation3], 4294966912 }
   0xb   :  { %335 = dma.done.wait [#allocation6], 2048  }
   0xc   :  { %336 = vsyncadd [#allocation6], 4294965248  ;;  %v71_v0 = vld [vmem:[#allocation5 + $0x78] sm:$0xff]  ;;  %v70_v1 = vld [vmem:[#allocation5 + $0x70] sm:$0xff]  ;;  %v343_v29 = vmov 128.0   ;;  %s198_s10 = sshll.u32 %s407_s5, 4  ;;  %s199_s10 = int_to_ptr.hbm [resolvable:$true] %s198_s10 }
   0xd   :  { %72 = vmatpush.msra.mxu0 %v71_v0  ;;  %213 = vmatpush.msra.mxu2 %v71_v0  ;;  %v69_v2 = vld [vmem:[#allocation5 + $0x68] sm:$0xff]  ;;  %v68_v3 = vld [vmem:[#allocation5 + $0x60] sm:$0xff]  ;;  %v67_v4 = vld [vmem:[#allocation5 + $0x58] sm:$0xff]  ;;  %253 = vrcp.f32 %v343_v29 }
   0xe   :  { %212 = vmatpush.msra.mxu1 %v71_v0  ;;  %v66_v5 = vld [vmem:[#allocation5 + $0x50] sm:$0xff]  ;;  %v65_v6 = vld [vmem:[#allocation5 + $0x48] sm:$0xff]  ;;  %v64_v7 = vld [vmem:[#allocation5 + $0x40] sm:$0xff] }
   0xf   :  { %73 = vmatpush.msra.mxu0 %v70_v1  ;;  %215 = vmatpush.msra.mxu2 %v70_v1  ;;  %v63_v8 = vld [vmem:[#allocation5 + $0x38] sm:$0xff]  ;;  %v62_v9 = vld [vmem:[#allocation5 + $0x30] sm:$0xff]  ;;  %v61_v10 = vld [vmem:[#allocation5 + $0x28] sm:$0xff] }
  0x10   :  { %214 = vmatpush.msra.mxu1 %v70_v1  ;;  %v60_v11 = vld [vmem:[#allocation5 + $0x20] sm:$0xff]  ;;  %v59_v12 = vld [vmem:[#allocation5 + $0x18] sm:$0xff]  ;;  %v58_v13 = vld [vmem:[#allocation5 + $0x10] sm:$0xff] }
  0x11   :  { %74 = vmatpush.msra.mxu0 %v69_v2  ;;  %217 = vmatpush.msra.mxu2 %v69_v2  ;;  %v57_v14 = vld [vmem:[#allocation5 + $0x8] sm:$0xff]  ;;  %v56_v15 = vld [vmem:[#allocation5] sm:$0xff]  ;;  %v55_v17 = vld [vmem:[#allocation2 + $0x10] sm:$0xff] }
  0x12   :  { %216 = vmatpush.msra.mxu1 %v69_v2  ;;  %v53_v16 = vld [vmem:[#allocation2] sm:$0xff]  ;;  %v54_v18 = vld [vmem:[#allocation2 + $0x8] sm:$0xff] }
  0x13   :  { %75 = vmatpush.msra.mxu0 %v68_v3  ;;  %219 = vmatpush.msra.mxu2 %v68_v3  ;;  %v250_v19 = vld [vmem:[%s404_s2] ss:$0 sm:$0xff]  ;;  %v254_v30 = vpop.eup %253 }
  0x14   :  { %218 = vmatpush.msra.mxu1 %v68_v3  ;;  %v117_v31 = vmul.f32 128.0, %v254_v30  ;;  %vm121_vm0 = vweird.f32 %v254_v30  ;;  %v251_v1 = vld [vmem:[%s405_s3] ss:$0 sm:$0xff]  ;;  %s344_s3 = smov [#allocation7]  }
  0x15   :  { %76 = vmatpush.msra.mxu0 %v67_v4  ;;  %221 = vmatpush.msra.mxu2 %v67_v4 }
  0x16   :  { %220 = vmatpush.msra.mxu1 %v67_v4  ;;  %v118_v32 = vsub.f32 1.0, %v117_v31 }
  0x17   :  { %77 = vmatpush.msra.mxu0 %v66_v5  ;;  %223 = vmatpush.msra.mxu2 %v66_v5 }
  0x18   :  { %222 = vmatpush.msra.mxu1 %v66_v5  ;;  %v119_v33 = vmul.f32 %v254_v30, %v118_v32  ;;  %v252_v5 = vld [vmem:[%s406_s4] ss:$0 sm:$0xff]  ;;  %s196_s4 = sshll.u32 %s344_s3, 4  ;;  %s197_s4 = int_to_ptr.vmem [resolvable:$true] %s196_s4 }
  0x19   :  { %78 = vmatpush.msra.mxu0 %v65_v6  ;;  %225 = vmatpush.msra.mxu2 %v65_v6 }
  0x1a   :  { %224 = vmatpush.msra.mxu1 %v65_v6  ;;  %v120_v34 = vadd.f32 %v254_v30, %v119_v33 }
  0x1b   :  { %79 = vmatpush.msra.mxu0 %v64_v7  ;;  %227 = vmatpush.msra.mxu2 %v64_v7 }
  0x1c   :  { %226 = vmatpush.msra.mxu1 %v64_v7  ;;  %v122_v35 = vsel %vm121_vm0, %v254_v30, %v120_v34 }
  0x1d   :  { %80 = vmatpush.msra.mxu0 %v63_v8  ;;  %229 = vmatpush.msra.mxu2 %v63_v8 }
  0x1e   :  { %228 = vmatpush.msra.mxu1 %v63_v8 }
  0x1f   :  { %81 = vmatpush.msra.mxu0 %v62_v9  ;;  %231 = vmatpush.msra.mxu2 %v62_v9 }
  0x20   :  { %230 = vmatpush.msra.mxu1 %v62_v9 }
  0x21   :  { %82 = vmatpush.msra.mxu0 %v61_v10  ;;  %233 = vmatpush.msra.mxu2 %v61_v10 }
  0x22   :  { %232 = vmatpush.msra.mxu1 %v61_v10 }
  0x23   :  { %83 = vmatpush.msra.mxu0 %v60_v11  ;;  %235 = vmatpush.msra.mxu2 %v60_v11 }
  0x24   :  { %234 = vmatpush.msra.mxu1 %v60_v11 }
  0x25   :  { %84 = vmatpush.msra.mxu0 %v59_v12  ;;  %237 = vmatpush.msra.mxu2 %v59_v12 }
  0x26   :  { %236 = vmatpush.msra.mxu1 %v59_v12 }
  0x27   :  { %85 = vmatpush.msra.mxu0 %v58_v13  ;;  %239 = vmatpush.msra.mxu2 %v58_v13 }
  0x28   :  { %238 = vmatpush.msra.mxu1 %v58_v13 }
  0x29   :  { %86 = vmatpush.msra.mxu0 %v57_v14  ;;  %241 = vmatpush.msra.mxu2 %v57_v14 }
  0x2a   :  { %240 = vmatpush.msra.mxu1 %v57_v14 }
  0x2b   :  { %87 = vmatpush.msra.mxu0 %v56_v15  ;;  %243 = vmatpush.msra.mxu2 %v56_v15 }
  0x2c   :  { %88 = vmatmul.f32.vlgmr.msra.gmra.mxu0 %v53_v16  ;;  %94 = vmatmul.f32.vlgmr.msra.gmra.mxu2 %v55_v17 }
  0x2d   :  { %242 = vmatpush.msra.mxu1 %v56_v15 }
  0x2e   :  { %91 = vmatmul.f32.vlgmr.msra.gmra.mxu1 %v54_v18 }
  0xa9   :  { %v89_v20 = vpop.f32.mrf.mxu0 }
  0xaa   :  { %v98_v21 = vadd.f32 %v89_v20, %v53_v16 }
  0xab   :  { %v92_v22 = vpop.f32.mrf.mxu1 }
  0xac   :  { %v105_v23 = vadd.f32 %v250_v19, %v98_v21  ;;  %v99_v24 = vadd.f32 %v92_v22, %v54_v18 }
  0xae   :  { %110 = vadd.xlane.f32.xlu0 %v105_v23  ;;  %v106_v28 = vadd.f32 %v250_v19, %v99_v24 }
  0xaf   :  { %v95_v25 = vpop.f32.mrf.mxu2 }
  0xb0   :  { %v100_v26 = vadd.f32 %v95_v25, %v55_v17 }
  0xb2   :  { %v107_v27 = vadd.f32 %v250_v19, %v100_v26 }
  0xb4   :  { %114 = vadd.xlane.f32.xlu1 %v107_v27 }
  0xb6   :  { %112 = vadd.xlane.f32.xlu0 %v106_v28 }
 0x121   :  { %v111_v36 = vpop.xlane.xlu0 %110 }
 0x122   :  { %v123_v37 = vmul.f32 %v122_v35, %v111_v36 }
 0x124   :  { %v126_v38 = vsub.f32 %v105_v23, %v123_v37 }
 0x126   :  { %v129_v39 = vmul.f32 %v126_v38, %v126_v38 }
 0x127   :  { %v115_v42 = vpop.xlane.xlu1 %114 }
 0x128   :  { %132 = vadd.xlane.f32.xlu1 %v129_v39  ;;  %v125_v44 = vmul.f32 %v122_v35, %v115_v42 }
 0x129   :  { %v113_v40 = vpop.xlane.xlu0 %112 }
 0x12a   :  { %v124_v41 = vmul.f32 %v122_v35, %v113_v40  ;;  %v128_v46 = vsub.f32 %v107_v27, %v125_v44 }
 0x12c   :  { %v127_v43 = vsub.f32 %v106_v28, %v124_v41  ;;  %v131_v47 = vmul.f32 %v128_v46, %v128_v46 }
 0x12e   :  { %v130_v45 = vmul.f32 %v127_v43, %v127_v43 }
 0x130   :  { %134 = vadd.xlane.f32.xlu2 %v130_v45 }
 0x138   :  { %136 = vadd.xlane.f32.xlu2 %v131_v47 }
 0x19b   :  { %v133_v48 = vpop.xlane.xlu1 %132 }
 0x19c   :  { %v138_v49 = vmul.f32 %v133_v48, %v122_v35 }
 0x19e   :  { %v141_v50 = vadd.f32 1e-05, %v138_v49 }
 0x1a0   :  { %255 = vrsqrt.f32 %v141_v50  ;;  %vm150_vm2 = vweird.f32 %v141_v50 }
 0x1a3   :  { %v135_v51 = vpop.xlane.xlu2 %134 }
 0x1a4   :  { %v139_v52 = vmul.f32 %v135_v51, %v122_v35 }
 0x1a6   :  { %v256_v53 = vpop.eup %255  ;;  %v142_v54 = vadd.f32 1e-05, %v139_v52 }
 0x1a7   :  { %v145_v55 = vmul.f32 %v256_v53, %v141_v50  ;;  %vm151_vm1 = vweird.f32 %v256_v53 }
 0x1a8   :  { %257 = vrsqrt.f32 %v142_v54  ;;  %vm152_vm3 = vmor %vm150_vm2, %vm151_vm1  ;;  %vm160_vm5 = vweird.f32 %v142_v54 }
 0x1a9   :  { %v146_v56 = vmul.f32 %v256_v53, %v145_v55 }
 0x1ab   :  { %v147_v57 = vmul.f32 0.5, %v146_v56  ;;  %v137_v58 = vpop.xlane.xlu2 %136 }
 0x1ac   :  { %v140_v59 = vmul.f32 %v137_v58, %v122_v35 }
 0x1ad   :  { %v148_v60 = vsub.f32 1.5, %v147_v57 }
 0x1ae   :  { %v258_v61 = vpop.eup %257  ;;  %v143_v62 = vadd.f32 1e-05, %v140_v59 }
 0x1af   :  { %v149_v63 = vmul.f32 %v256_v53, %v148_v60  ;;  %v155_v0 = vmul.f32 %v258_v61, %v142_v54  ;;  %vm161_vm4 = vweird.f32 %v258_v61 }
 0x1b0   :  { %259 = vrsqrt.f32 %v143_v62  ;;  %vm162_vm6 = vmor %vm160_vm5, %vm161_vm4  ;;  %vm170_vm8 = vweird.f32 %v143_v62 }
 0x1b1   :  { %v153_v2 = vsel %vm152_vm3, %v256_v53, %v149_v63  ;;  %v156_v3 = vmul.f32 %v258_v61, %v155_v0 }
 0x1b2   :  { %v174_v4 = vmul.f32 %v153_v2, %v126_v38 }
 0x1b3   :  { %v157_v6 = vmul.f32 0.5, %v156_v3 }
 0x1b4   :  { %v180_v7 = vmul.f32 %v251_v1, %v174_v4 }
 0x1b5   :  { %v158_v8 = vsub.f32 1.5, %v157_v6 }
 0x1b6   :  { %v260_v9 = vpop.eup %259  ;;  %v186_v10 = vadd.f32 %v252_v5, %v180_v7 }
 0x1b7   :  { %v159_v11 = vmul.f32 %v258_v61, %v158_v8  ;;  %v165_v12 = vmul.f32 %v260_v9, %v143_v62  ;;  %vm171_vm7 = vweird.f32 %v260_v9 }
 0x1b8   :  { %189 = vst [vmem:[#allocation7] sm:$0xff] %v186_v10  ;;  %vm172_vm9 = vmor %vm170_vm8, %vm171_vm7 }
 0x1b9   :  { %v163_v13 = vsel %vm162_vm6, %v258_v61, %v159_v11  ;;  %v166_v14 = vmul.f32 %v260_v9, %v165_v12 }
 0x1ba   :  { %v175_v15 = vmul.f32 %v163_v13, %v127_v43 }
 0x1bb   :  { %v167_v16 = vmul.f32 0.5, %v166_v14 }
 0x1bc   :  { %v181_v17 = vmul.f32 %v251_v1, %v175_v15 }
 0x1bd   :  { %v168_v18 = vsub.f32 1.5, %v167_v16 }
 0x1be   :  { %v187_v19 = vadd.f32 %v252_v5, %v181_v17 }
 0x1bf   :  { %v169_v20 = vmul.f32 %v260_v9, %v168_v18 }
 0x1c0   :  { %190 = vst [vmem:[#allocation7 + $0x8] sm:$0xff] %v187_v19 }
 0x1c1   :  { %v173_v21 = vsel %vm172_vm9, %v260_v9, %v169_v20 }
 0x1c2   :  { %v176_v22 = vmul.f32 %v173_v21, %v128_v46 }
 0x1c4   :  { %v182_v23 = vmul.f32 %v251_v1, %v176_v22 }
 0x1c6   :  { %v188_v24 = vadd.f32 %v252_v5, %v182_v23 }
 0x1c8   :  { %191 = vst [vmem:[#allocation7 + $0x10] sm:$0xff] %v188_v24 }
 0x1c9   :  { %204 = dma.vmem_to_hbm [thread:$0]  %s197_s4, 384, %s199_s10, [#allocation4], %s340_s26, %s340_s26, %s341_s27  }
 0x1ca   :  { %337 = dma.done.wait [#allocation4], 384  }
 0x1cb   :  { %338 = vsyncadd [#allocation4], 4294966912 }
 0x1cc   :  { %209 = vsyncpa [#allocation3], 1 }
 0x1cd   :  { %210 = vsyncpa [#allocation6], 1 }
 0x1ce   :  { %211 = vsyncpa [#allocation4], 1 }

</bundles_post_ra>
